<compile_context>
chip_gen: v5e
topology: v5e:2x2
jax: 0.10.0
libtpu: 0.0.40
codegen_flags: <defaults>
</compile_context>

<pallas_src>
import jax
import jax.numpy as jnp
from jax.experimental import pallas as pl
from jax.experimental.pallas import tpu as pltpu


def _gelu_tanh(x):
    # GELU with tanh approximation (matches torch GELU(approximate='tanh')).
    c = 0.7978845608028654  # sqrt(2/pi)
    return 0.5 * x * (1.0 + jnp.tanh(c * (x + 0.044715 * x * x * x)))


def _round_up(x, m):
    return (x + m - 1) // m * m


def _choose_batch_tile(B):
    """8-aligned tile, capped at 2048 rows; >=2 grid steps once B >= 16 (megacore)."""
    MAX_TILE = 2048
    if B <= 8:
        return 8
    return min(_round_up(pl.cdiv(B, 2), 8), MAX_TILE)


def hyperagent_kernel(
    u_ref,      # (tb, A+S1+S2+2+1)  act dtype  packed [onehot|single|trend|class|1]
    wx_ref,     # (A+S+3, 3H)        block-diag [emb | fc1.W,b1 | fc2.W,b2]
    wada_ref,   # (H+1, 4H)          [adaLN.W; adaLN.b]
    wn1_ref,    # (2H+1, 4H)         [net[0].W; net[0].b]
    wn2_ref,    # (4H+1, 6)          [net[2].W; net[2].b]
    out_ref,    # (tb, 6)            f32
):
    H = wada_ref.shape[0] - 1
    H2 = 2 * H

    # --- fused embedding + fc1 + fc2: ONE block-diagonal matmul -------------
    # TODO(synk): out-of-range previous_action silently yields a zero embedding
    # row via the one-hot matmul, whereas PyTorch nn.Embedding would raise.
    xc = jnp.dot(u_ref[...], wx_ref[...],
                 preferred_element_type=jnp.float32)          # (tb, 3H) f32
    x = xc[:, :H2]                                            # [action|state] hidden
    c = xc[:, H2:]                                            # fc2(class_state)

    # --- SiLU via EUP exp + approx reciprocal (off the output path) ----------
    c_silu = c * pl.reciprocal(1.0 + jnp.exp(-c), approx=True)

    # --- adaLN: single (H,4H) matmul + bias row, static lane slices ----------
    wada = wada_ref[...]
    ada = (jnp.dot(c_silu.astype(wada.dtype), wada[:H, :],
                   preferred_element_type=jnp.float32)
           + wada[H:H + 1, :].astype(jnp.float32))            # (tb, 4H)
    shift = ada[:, :H2]
    scale = ada[:, H2:]

    # --- LayerNorm(2H, no affine, eps=1e-6): E[x^2]-E[x]^2 form ---------------
    inv_n = 1.0 / H2
    mean = jnp.sum(x, axis=1, keepdims=True) * inv_n
    mean_sq = jnp.sum(x * x, axis=1, keepdims=True) * inv_n
    var = mean_sq - mean * mean
    x_norm = (x - mean) * jax.lax.rsqrt(var + 1e-6)

    # --- modulate -------------------------------------------------------------
    x_mod = x_norm * (1.0 + scale) + shift                    # (tb, 2H)

    # --- net: Linear(2H,4H) -> GELU(tanh) -> Linear(4H,6) -> Softmax ----------
    wn1 = wn1_ref[...]
    h = (jnp.dot(x_mod.astype(wn1.dtype), wn1[:H2, :],
                 preferred_element_type=jnp.float32)
         + wn1[H2:H2 + 1, :].astype(jnp.float32))             # (tb, 4H)
    g = _gelu_tanh(h)

    wn2 = wn2_ref[...]
    K2 = wn2_ref.shape[0] - 1
    logits = (jnp.dot(g.astype(wn2.dtype), wn2[:K2, :],
                      preferred_element_type=jnp.float32)
              + wn2[K2:K2 + 1, :].astype(jnp.float32))        # (tb, 6)

    m = jnp.max(logits, axis=1, keepdims=True)
    e = jnp.exp(logits - m)
    # exact divide so rows sum to 1 to f32 eps (one div per row, off hot path)
    out_ref[...] = e / jnp.sum(e, axis=1, keepdims=True)


def hyperagent_forward(params, single_state, trend_state, class_state,
                       previous_action, *, batch_tile=None):
    """Pure-JAX wrapper around the fused Pallas kernel."""
    B, S1 = single_state.shape
    S2 = trend_state.shape[1]
    wx = params["W_x"]
    wada = params["W_ada"]
    wn1 = params["W_n1"]
    wn2 = params["W_n2"]
    H = wada.shape[0] - 1
    H2 = 2 * H
    out_dim = wn2.shape[1]
    A = wx.shape[0] - (S1 + S2) - 2 - 1        # action_dim
    act_dtype = wx.dtype

    # --- pack ALL per-row activations into one lane-contiguous buffer --------
    # (single fused XLA op; one DMA per grid step inside the kernel)
    onehot = jax.nn.one_hot(previous_action.astype(jnp.int32), A, dtype=act_dtype)
    u = jnp.concatenate(
        [onehot,
         single_state.astype(act_dtype),
         trend_state.astype(act_dtype),
         class_state.astype(act_dtype),
         jnp.ones((B, 1), act_dtype)], axis=1)                # (B, A+S1+S2+3)

    # --- batch tiling: pad B up to grid * tile (tile 8-aligned) ---------------
    if batch_tile is None:
        batch_tile = _choose_batch_tile(B)
    batch_tile = max(8, _round_up(int(batch_tile), 8))
    grid_b = pl.cdiv(B, batch_tile)
    B_pad = grid_b * batch_tile
    if B_pad != B:
        u = jnp.pad(u, ((0, B_pad - B), (0, 0)))              # padded rows -> zeros

    U = u.shape[1]

    def w_spec(shape):
        return pl.BlockSpec(shape, lambda i: (0, 0))

    flops = int(2 * B_pad * (U * 3 * H              # fused embed+fc1+fc2
                             + H * 4 * H            # adaLN
                             + H2 * 4 * H           # net[0]
                             + 4 * H * out_dim))    # net[2]
    transcendentals = int(B_pad * (H + 4 * H + out_dim + H + 2))
    in_arrays = (u, wx, wada, wn1, wn2)
    bytes_accessed = int(sum(a.size * a.dtype.itemsize for a in in_arrays)
                         + B_pad * out_dim * 4)

    cp_kwargs = dict(dimension_semantics=("parallel",))
    if batch_tile > 4096:
        # only needed if the caller forces very large tiles (v5e default 16 MiB)
        cp_kwargs["vmem_limit_bytes"] = 64 * 1024 * 1024

    out = pl.pallas_call(
        hyperagent_kernel,
        out_shape=jax.ShapeDtypeStruct((B_pad, out_dim), jnp.float32),
        grid=(grid_b,),
        in_specs=[
            pl.BlockSpec((batch_tile, U), lambda i: (i, 0)),   # packed activations
            w_spec(wx.shape),
            w_spec(wada.shape),
            w_spec(wn1.shape),
            w_spec(wn2.shape),
        ],
        out_specs=pl.BlockSpec((batch_tile, out_dim), lambda i: (i, 0)),
        compiler_params=pltpu.CompilerParams(**cp_kwargs),
        cost_estimate=pl.CostEstimate(flops=flops,
                                      transcendentals=transcendentals,
                                      bytes_accessed=bytes_accessed),
    )(*in_arrays)

    return out[:B] if B_pad != B else out


def init_params(key, state_dim_1, state_dim_2, action_dim, hidden_dim,
                param_dtype=jnp.bfloat16):
    """Synthetic init matching the PyTorch module's shapes, pre-packed for the kernel.

    Packing (done once at init, not per call), all stored in `param_dtype`:
      W_x   (A+S+3, 3H): block-diag [emb | 0 | 0 ; 0 | fc1.W | 0 ; 0 | 0 | fc2.W ;
                                     0 | fc1.b | fc2.b]   (last row = biases)
      W_ada (H+1, 4H):   [adaLN.W; adaLN.b]
      W_n1  (2H+1, 4H):  [net[0].W; net[0].b]
      W_n2  (4H+1, 6):   [net[2].W; net[2].b] (zero-initialized, as in the module)
    All linear weights are stored (in_features, out_features).
    """
    H = hidden_dim
    S = state_dim_1 + state_dim_2
    A = action_dim
    ks = jax.random.split(key, 5)

    def lin(k, fan_in, fan_out):
        bound = 1.0 / float(fan_in) ** 0.5
        kw, kb = jax.random.split(k)
        w = jax.random.uniform(kw, (fan_in, fan_out), jnp.float32, -bound, bound)
        b = jax.random.uniform(kb, (fan_out,), jnp.float32, -bound, bound)
        return w, b

    w1, b1 = lin(ks[0], S, H)            # fc1
    w2, b2 = lin(ks[1], 2, H)            # fc2
    emb = jax.random.normal(ks[2], (A, H), jnp.float32)   # nn.Embedding ~ N(0,1)
    wada, bada = lin(ks[3], H, 4 * H)    # adaLN_modulation[1]
    wn1, bn1 = lin(ks[4], 2 * H, 4 * H)  # net[0]
    wn2 = jnp.zeros((4 * H, 6), jnp.float32)   # nn.init.zeros_
    bn2 = jnp.zeros((6,), jnp.float32)         # nn.init.zeros_

    W_x = jnp.zeros((A + S + 3, 3 * H), jnp.float32)
    W_x = W_x.at[:A, :H].set(emb)                      # embedding block
    W_x = W_x.at[A:A + S, H:2 * H].set(w1)             # fc1 weight block
    W_x = W_x.at[A + S:A + S + 2, 2 * H:].set(w2)      # fc2 weight block
    W_x = W_x.at[A + S + 2, H:2 * H].set(b1)           # fc1 bias (bias column = 1)
    W_x = W_x.at[A + S + 2, 2 * H:].set(b2)            # fc2 bias

    W_ada = jnp.concatenate([wada, bada[None, :]], axis=0)
    W_n1 = jnp.concatenate([wn1, bn1[None, :]], axis=0)
    W_n2 = jnp.concatenate([wn2, bn2[None, :]], axis=0)

    return {"W_x": W_x.astype(param_dtype),
            "W_ada": W_ada.astype(param_dtype),
            "W_n1": W_n1.astype(param_dtype),
            "W_n2": W_n2.astype(param_dtype)}


def hyperagent_reference(params, single, trend, cls, prev):
    """Pure-jnp f32 reference (mirrors the PyTorch forward) for correctness checks."""
    Wx = params["W_x"].astype(jnp.float32)
    Wada = params["W_ada"].astype(jnp.float32)
    Wn1 = params["W_n1"].astype(jnp.float32)
    Wn2 = params["W_n2"].astype(jnp.float32)
    S = single.shape[1] + trend.shape[1]
    H = Wada.shape[0] - 1
    A = Wx.shape[0] - S - 3
    emb = Wx[:A, :H]
    w1, b1 = Wx[A:A + S, H:2 * H], Wx[A + S + 2, H:2 * H]
    w2, b2 = Wx[A + S:A + S + 2, 2 * H:], Wx[A + S + 2, 2 * H:]
    wada, bada = Wada[:H], Wada[H]
    wn1, bn1 = Wn1[:2 * H], Wn1[2 * H]
    wn2, bn2 = Wn2[:4 * H], Wn2[4 * H]

    action_hidden = emb[prev.astype(jnp.int32)]
    state_hidden = jnp.concatenate([single, trend], axis=1) @ w1 + b1
    x = jnp.concatenate([action_hidden, state_hidden], axis=1)
    c = cls @ w2 + b2
    c = c * jax.nn.sigmoid(c)
    ada = c @ wada + bada
    shift, scale = ada[:, :2 * H], ada[:, 2 * H:]
    mean = x.mean(axis=1, keepdims=True)
    var = ((x - mean) ** 2).mean(axis=1, keepdims=True)
    xn = (x - mean) / jnp.sqrt(var + 1e-6)
    xm = xn * (1.0 + scale) + shift
    h = xm @ wn1 + bn1
    g = _gelu_tanh(h)
    logits = g @ wn2 + bn2
    return jax.nn.softmax(logits, axis=1)


if __name__ == "__main__":
    # Small, module-consistent shapes.
    B = 8
    state_dim_1, state_dim_2 = 10, 6
    action_dim = 6
    hidden_dim = 32

    key = jax.random.PRNGKey(0)
    k_params, k1, k2, k3, k4, k5 = jax.random.split(key, 6)

    params = init_params(k_params, state_dim_1, state_dim_2, action_dim, hidden_dim)

    single_state = jax.random.normal(k1, (B, state_dim_1), jnp.float32)
    trend_state = jax.random.normal(k2, (B, state_dim_2), jnp.float32)
    class_state = jax.random.normal(k3, (B, 2), jnp.float32)
    previous_action = jax.random.randint(k4, (B,), 0, action_dim, jnp.int32)

    # 1) Canonical module (zero-init head): softmax rows = uniform 1/6.
    out = hyperagent_forward(params, single_state, trend_state, class_state,
                             previous_action)
    out = jax.block_until_ready(out)
    assert out.shape == (B, 6)
    assert bool(jnp.all(jnp.abs(jnp.sum(out, axis=1) - 1.0) < 1e-3))
    assert bool(jnp.all(jnp.abs(out - 1.0 / 6.0) < 1e-3))

    # 2) Numerics check with a non-zero head vs a pure-jnp f32 reference
    #    (tolerance covers bf16 matmul operands + EUP approx SiLU reciprocal).
    params_nz = dict(params)
    params_nz["W_n2"] = (0.1 * jax.random.normal(k5, params["W_n2"].shape,
                                                 jnp.float32)
                         ).astype(params["W_n2"].dtype)
    out_nz = hyperagent_forward(params_nz, single_state, trend_state, class_state,
                                previous_action)
    ref_nz = hyperagent_reference(params_nz, single_state, trend_state, class_state,
                                  previous_action)
    out_nz, ref_nz = jax.block_until_ready((out_nz, ref_nz))
    assert bool(jnp.all(jnp.abs(out_nz - ref_nz) < 3e-2))
    assert bool(jnp.all(jnp.abs(jnp.sum(out_nz, axis=1) - 1.0) < 1e-3))

    # 3) Awkward batch size: exercises padding + a >=2-step parallel grid.
    B2 = 20
    kk = jax.random.split(jax.random.PRNGKey(1), 4)
    s2 = jax.random.normal(kk[0], (B2, state_dim_1), jnp.float32)
    t2 = jax.random.normal(kk[1], (B2, state_dim_2), jnp.float32)
    c2 = jax.random.normal(kk[2], (B2, 2), jnp.float32)
    p2 = jax.random.randint(kk[3], (B2,), 0, action_dim, jnp.int32)
    out2 = hyperagent_forward(params_nz, s2, t2, c2, p2)
    ref2 = hyperagent_reference(params_nz, s2, t2, c2, p2)
    out2, ref2 = jax.block_until_ready((out2, ref2))
    assert out2.shape == (B2, 6)
    assert bool(jnp.all(jnp.abs(out2 - ref2) < 3e-2))

    print("KERNEL_OK")
</pallas_src>

<mosaic_0001>
module attributes {stable_mosaic.version = 11 : i64} {
  func.func @hyperagent_kernel(%arg0: i32, %arg1: memref<8x25xbf16, #tpu.memory_space<vmem>>, %arg2: memref<25x96xbf16, #tpu.memory_space<vmem>>, %arg3: memref<33x128xbf16, #tpu.memory_space<vmem>>, %arg4: memref<65x128xbf16, #tpu.memory_space<vmem>>, %arg5: memref<129x6xbf16, #tpu.memory_space<vmem>>, %arg6: memref<8x6xf32, #tpu.memory_space<vmem>>) attributes {dimension_semantics = [#tpu.dimension_semantics<parallel>], iteration_bounds = array<i64: 1>, scalar_prefetch = 0 : i64, scratch_operands = 0 : i64, tpu.core_type = #tpu.core_type<tc>, window_params = [{transform_indices = @transform_0, window_bounds = array<i64: 8, 25>}, {pipeline_mode = #tpu.pipeline_mode<synchronous>, transform_indices = @transform_1, window_bounds = array<i64: 25, 96>}, {pipeline_mode = #tpu.pipeline_mode<synchronous>, transform_indices = @transform_2, window_bounds = array<i64: 33, 128>}, {pipeline_mode = #tpu.pipeline_mode<synchronous>, transform_indices = @transform_3, window_bounds = array<i64: 65, 128>}, {pipeline_mode = #tpu.pipeline_mode<synchronous>, transform_indices = @transform_4, window_bounds = array<i64: 129, 6>}, {transform_indices = @transform_5, window_bounds = array<i64: 8, 6>}]} {
    %c0 = arith.constant 0 : index
    %c0_0 = arith.constant 0 : index
    %0 = vector.load %arg1[%c0, %c0_0] : memref<8x25xbf16, #tpu.memory_space<vmem>>, vector<8x25xbf16>
    %c0_1 = arith.constant 0 : index
    %c0_2 = arith.constant 0 : index
    %1 = vector.load %arg2[%c0_1, %c0_2] : memref<25x96xbf16, #tpu.memory_space<vmem>>, vector<25x96xbf16>
    %cst = arith.constant dense<0.000000e+00> : vector<8x96xf32>
    %2 = tpu.matmul %0, %1, %cst {dimension_numbers = #tpu.dot_dimension_numbers<[1], [0], [0], [1], [0, 0, 1, 1], [], []>} : vector<8x25xbf16>, vector<25x96xbf16>, vector<8x96xf32> -> vector<8x96xf32>
    %3 = vector.extract_strided_slice %2 {offsets = [0, 0], sizes = [8, 64], strides = [1, 1]} : vector<8x96xf32> to vector<8x64xf32>
    %4 = vector.extract_strided_slice %2 {offsets = [0, 64], sizes = [8, 32], strides = [1, 1]} : vector<8x96xf32> to vector<8x32xf32>
    %cst_3 = arith.constant 0.000000e+00 : f32
    %5 = vector.broadcast %cst_3 : f32 to vector<8x32xf32>
    %6 = arith.subf %5, %4 : vector<8x32xf32>
    %7 = math.exp %6 : vector<8x32xf32>
    %cst_4 = arith.constant 1.000000e+00 : f32
    %8 = vector.broadcast %cst_4 : f32 to vector<8x32xf32>
    %9 = arith.addf %8, %7 : vector<8x32xf32>
    %10 = tpu.reciprocal %9 {approx = true} : vector<8x32xf32> -> vector<8x32xf32>
    %11 = arith.mulf %4, %10 : vector<8x32xf32>
    %c0_5 = arith.constant 0 : index
    %c0_6 = arith.constant 0 : index
    %12 = vector.load %arg3[%c0_5, %c0_6] : memref<33x128xbf16, #tpu.memory_space<vmem>>, vector<33x128xbf16>
    %13 = arith.truncf %11 : vector<8x32xf32> to vector<8x32xbf16>
    %14 = vector.extract_strided_slice %12 {offsets = [0, 0], sizes = [32, 128], strides = [1, 1]} : vector<33x128xbf16> to vector<32x128xbf16>
    %cst_7 = arith.constant dense<0.000000e+00> : vector<8x128xf32>
    %15 = tpu.matmul %13, %14, %cst_7 {dimension_numbers = #tpu.dot_dimension_numbers<[1], [0], [0], [1], [0, 0, 1, 1], [], []>} : vector<8x32xbf16>, vector<32x128xbf16>, vector<8x128xf32> -> vector<8x128xf32>
    %16 = vector.extract_strided_slice %12 {offsets = [32, 0], sizes = [1, 128], strides = [1, 1]} : vector<33x128xbf16> to vector<1x128xbf16>
    %17 = arith.extf %16 : vector<1x128xbf16> to vector<1x128xf32>
    %18 = vector.broadcast %17 : vector<1x128xf32> to vector<8x128xf32>
    %19 = arith.addf %15, %18 : vector<8x128xf32>
    %20 = vector.extract_strided_slice %19 {offsets = [0, 0], sizes = [8, 64], strides = [1, 1]} : vector<8x128xf32> to vector<8x64xf32>
    %21 = vector.extract_strided_slice %19 {offsets = [0, 64], sizes = [8, 64], strides = [1, 1]} : vector<8x128xf32> to vector<8x64xf32>
    %cst_8 = arith.constant dense<0.000000e+00> : vector<8xf32>
    %22 = vector.multi_reduction <add>, %3, %cst_8 [1] : vector<8x64xf32> to vector<8xf32>
    %23 = vector.shape_cast %22 : vector<8xf32> to vector<8x1xf32>
    %cst_9 = arith.constant 1.562500e-02 : f32
    %24 = vector.broadcast %cst_9 : f32 to vector<8x1xf32>
    %25 = arith.mulf %23, %24 : vector<8x1xf32>
    %26 = arith.mulf %3, %3 : vector<8x64xf32>
    %cst_10 = arith.constant dense<0.000000e+00> : vector<8xf32>
    %27 = vector.multi_reduction <add>, %26, %cst_10 [1] : vector<8x64xf32> to vector<8xf32>
    %28 = vector.shape_cast %27 : vector<8xf32> to vector<8x1xf32>
    %cst_11 = arith.constant 1.562500e-02 : f32
    %29 = vector.broadcast %cst_11 : f32 to vector<8x1xf32>
    %30 = arith.mulf %28, %29 : vector<8x1xf32>
    %31 = arith.mulf %25, %25 : vector<8x1xf32>
    %32 = arith.subf %30, %31 : vector<8x1xf32>
    %33 = vector.broadcast %25 : vector<8x1xf32> to vector<8x64xf32>
    %34 = arith.subf %3, %33 : vector<8x64xf32>
    %cst_12 = arith.constant 9.99999997E-7 : f32
    %35 = vector.broadcast %cst_12 : f32 to vector<8x1xf32>
    %36 = arith.addf %32, %35 : vector<8x1xf32>
    %37 = math.rsqrt %36 : vector<8x1xf32>
    %38 = vector.broadcast %37 : vector<8x1xf32> to vector<8x64xf32>
    %39 = arith.mulf %34, %38 : vector<8x64xf32>
    %cst_13 = arith.constant 1.000000e+00 : f32
    %40 = vector.broadcast %cst_13 : f32 to vector<8x64xf32>
    %41 = arith.addf %40, %21 : vector<8x64xf32>
    %42 = arith.mulf %39, %41 : vector<8x64xf32>
    %43 = arith.addf %42, %20 : vector<8x64xf32>
    %c0_14 = arith.constant 0 : index
    %c0_15 = arith.constant 0 : index
    %44 = vector.load %arg4[%c0_14, %c0_15] : memref<65x128xbf16, #tpu.memory_space<vmem>>, vector<65x128xbf16>
    %45 = arith.truncf %43 : vector<8x64xf32> to vector<8x64xbf16>
    %46 = vector.extract_strided_slice %44 {offsets = [0, 0], sizes = [64, 128], strides = [1, 1]} : vector<65x128xbf16> to vector<64x128xbf16>
    %cst_16 = arith.constant dense<0.000000e+00> : vector<8x128xf32>
    %47 = tpu.matmul %45, %46, %cst_16 {dimension_numbers = #tpu.dot_dimension_numbers<[1], [0], [0], [1], [0, 0, 1, 1], [], []>} : vector<8x64xbf16>, vector<64x128xbf16>, vector<8x128xf32> -> vector<8x128xf32>
    %48 = vector.extract_strided_slice %44 {offsets = [64, 0], sizes = [1, 128], strides = [1, 1]} : vector<65x128xbf16> to vector<1x128xbf16>
    %49 = arith.extf %48 : vector<1x128xbf16> to vector<1x128xf32>
    %50 = vector.broadcast %49 : vector<1x128xf32> to vector<8x128xf32>
    %51 = arith.addf %47, %50 : vector<8x128xf32>
    %cst_17 = arith.constant 5.000000e-01 : f32
    %52 = vector.broadcast %cst_17 : f32 to vector<8x128xf32>
    %53 = arith.mulf %52, %51 : vector<8x128xf32>
    %cst_18 = arith.constant 4.471500e-02 : f32
    %54 = vector.broadcast %cst_18 : f32 to vector<8x128xf32>
    %55 = arith.mulf %54, %51 : vector<8x128xf32>
    %56 = arith.mulf %55, %51 : vector<8x128xf32>
    %57 = arith.mulf %56, %51 : vector<8x128xf32>
    %58 = arith.addf %51, %57 : vector<8x128xf32>
    %cst_19 = arith.constant 0.797884583 : f32
    %59 = vector.broadcast %cst_19 : f32 to vector<8x128xf32>
    %60 = arith.mulf %59, %58 : vector<8x128xf32>
    %61 = math.tanh %60 : vector<8x128xf32>
    %cst_20 = arith.constant 1.000000e+00 : f32
    %62 = vector.broadcast %cst_20 : f32 to vector<8x128xf32>
    %63 = arith.addf %62, %61 : vector<8x128xf32>
    %64 = arith.mulf %53, %63 : vector<8x128xf32>
    %c0_21 = arith.constant 0 : index
    %c0_22 = arith.constant 0 : index
    %65 = vector.load %arg5[%c0_21, %c0_22] : memref<129x6xbf16, #tpu.memory_space<vmem>>, vector<129x6xbf16>
    %66 = arith.truncf %64 : vector<8x128xf32> to vector<8x128xbf16>
    %67 = vector.extract_strided_slice %65 {offsets = [0, 0], sizes = [128, 6], strides = [1, 1]} : vector<129x6xbf16> to vector<128x6xbf16>
    %cst_23 = arith.constant dense<0.000000e+00> : vector<8x6xf32>
    %68 = tpu.matmul %66, %67, %cst_23 {dimension_numbers = #tpu.dot_dimension_numbers<[1], [0], [0], [1], [0, 0, 1, 1], [], []>} : vector<8x128xbf16>, vector<128x6xbf16>, vector<8x6xf32> -> vector<8x6xf32>
    %69 = vector.extract_strided_slice %65 {offsets = [128, 0], sizes = [1, 6], strides = [1, 1]} : vector<129x6xbf16> to vector<1x6xbf16>
    %70 = arith.extf %69 : vector<1x6xbf16> to vector<1x6xf32>
    %71 = vector.broadcast %70 : vector<1x6xf32> to vector<8x6xf32>
    %72 = arith.addf %68, %71 : vector<8x6xf32>
    %cst_24 = arith.constant dense<0xFF800000> : vector<8xf32>
    %73 = vector.multi_reduction <maximumf>, %72, %cst_24 [1] : vector<8x6xf32> to vector<8xf32>
    %74 = vector.shape_cast %73 : vector<8xf32> to vector<8x1xf32>
    %75 = vector.broadcast %74 : vector<8x1xf32> to vector<8x6xf32>
    %76 = arith.subf %72, %75 : vector<8x6xf32>
    %77 = math.exp %76 : vector<8x6xf32>
    %cst_25 = arith.constant dense<0.000000e+00> : vector<8xf32>
    %78 = vector.multi_reduction <add>, %77, %cst_25 [1] : vector<8x6xf32> to vector<8xf32>
    %79 = vector.shape_cast %78 : vector<8xf32> to vector<8x1xf32>
    %80 = vector.broadcast %79 : vector<8x1xf32> to vector<8x6xf32>
    %81 = arith.divf %77, %80 : vector<8x6xf32>
    %c0_26 = arith.constant 0 : index
    %c0_27 = arith.constant 0 : index
    %82 = vector.load %arg6[%c0_26, %c0_27] : memref<8x6xf32, #tpu.memory_space<vmem>>, vector<8x6xf32>
    tpu.vector_store %arg6[%c0_26, %c0_27], %81 {strides = array<i32>} : memref<8x6xf32, #tpu.memory_space<vmem>>, vector<8x6xf32>,
    return
  }
  func.func @transform_0(%arg0: i32) -> (i32, i32) {
    %c0_i32 = arith.constant 0 : i32
    %c0_i32_0 = arith.constant 0 : i32
    return %arg0, %c0_i32 : i32, i32
  }
  func.func @transform_1(%arg0: i32) -> (i32, i32) {
    %c0_i32 = arith.constant 0 : i32
    %c0_i32_0 = arith.constant 0 : i32
    %c0_i32_1 = arith.constant 0 : i32
    return %c0_i32, %c0_i32_0 : i32, i32
  }
  func.func @transform_2(%arg0: i32) -> (i32, i32) {
    %c0_i32 = arith.constant 0 : i32
    %c0_i32_0 = arith.constant 0 : i32
    %c0_i32_1 = arith.constant 0 : i32
    return %c0_i32, %c0_i32_0 : i32, i32
  }
  func.func @transform_3(%arg0: i32) -> (i32, i32) {
    %c0_i32 = arith.constant 0 : i32
    %c0_i32_0 = arith.constant 0 : i32
    %c0_i32_1 = arith.constant 0 : i32
    return %c0_i32, %c0_i32_0 : i32, i32
  }
  func.func @transform_4(%arg0: i32) -> (i32, i32) {
    %c0_i32 = arith.constant 0 : i32
    %c0_i32_0 = arith.constant 0 : i32
    %c0_i32_1 = arith.constant 0 : i32
    return %c0_i32, %c0_i32_0 : i32, i32
  }
  func.func @transform_5(%arg0: i32) -> (i32, i32) {
    %c0_i32 = arith.constant 0 : i32
    %c0_i32_0 = arith.constant 0 : i32
    return %arg0, %c0_i32 : i32, i32
  }
}

</mosaic_0001>

<bundles_post_ra>
// kernel: tpu_custom_call.1
= control target key start
LH: loop header
LB: loop body
LE: loop exit
PB: predicated region body
PF: predicated region fallthrough
CT: control target
= control target key end

     0   :  { %vm42_vm0 = vcmask 1043456   ;;  %vm43_vm1 = vcmask 1044480   ;;  %v448_v3 = vmov 65535   ;;  %s561_s0 = inlined_call_operand.vmem [shape: bf16[8,25], index: 0, kind: input, shape index: {}]   ;;  %s562_s1 = inlined_call_operand.vmem [shape: bf16[25,96], index: 1, kind: input, shape index: {}]   ;;  %s563_s2 = inlined_call_operand.vmem [shape: bf16[33,128], index: 2, kind: input, shape index: {}]   ;;  %s564_s3 = inlined_call_operand.vmem [shape: bf16[65,128], index: 3, kind: input, shape index: {}]   ;;  %s565_s4 = inlined_call_operand.vmem [shape: bf16[129,6], index: 4, kind: input, shape index: {}]   ;;  %s566_s5 = inlined_call_operand.hbm [shape: f32[8,6], index: 5, kind: output, shape index: {}]  }
   0x1   :  { %v330_v0 = vld [vmem:[%s562_s1 + $0x8] sm:$0xf]  ;;  %v392_v1 = vld [vmem:[%s562_s1 + $0x8] sm:$0x10]  ;;  %v44_v4 = vsel %vm42_vm0, 4294967295, %v448_v3 }
   0x2   :  { %v331_v2 = vor.u32 %v392_v1, %v330_v0 }
   0x3   :  { %10 = vsyncpa [#allocation3], 0  ;;  %v45_v5 = vsel %vm43_vm1, %v44_v4, 0  ;;  %v391_v7 = vld [vmem:[%s562_s1] sm:$0xff]  ;;  %vm38_vm2 = vcmask 203776   ;;  %vm108_vm3 = vcmask 523264  }
   0x4   :  { %v47_v6 = vand.u32 %v331_v2, %v45_v5  ;;  %v22_v8 = vld [vmem:[%s561_s0] sm:$0xf]  ;;  %s449_s0 = smov 64   ;;  %v394_v21 = vld [vmem:[%s563_s2 + $0x8] sm:$0xff]  ;;  %vm91_vm4 = vcmask 261120   ;;  %v398_v24 = vld [vmem:[%s564_s3 + $0x18] sm:$0xff] }
   0x5   :  { %101 = vmatpush.bf16.msra.mxu1 %v394_v21  ;;  %v393_v22 = vld [vmem:[%s563_s2] sm:$0xff]  ;;  %183 = vmatpush.bf16.msra.mxu2 %v398_v24  ;;  %v397_v25 = vld [vmem:[%s564_s3 + $0x10] sm:$0xff]  ;;  %v396_v26 = vld [vmem:[%s564_s3 + $0x8] sm:$0xff]  ;;  %vm282_vm8 = vcmask 48128   ;;  %s315_s8 = sshll.u32 %s566_s5, 4  ;;  %s316_s8 = int_to_ptr.hbm [resolvable:$true] %s315_s8 }
   0x6   :  { %55 = vmatpush.bf16.msra.mxu0 %v47_v6  ;;  %v72_v27 = vld [vmem:[%s563_s2 + $0x10] sm:$0x1]  ;;  %v395_v41 = vld [vmem:[%s564_s3] sm:$0xff]  ;;  %v406_v43 = vld [vmem:[%s565_s4 + $0x38] sm:$0xff] }
   0x7   :  { %v74_v28 = vunpack.c.l.bf16 %v72_v27  ;;  %269 = vmatpush.bf16.msra.mxu3 %v406_v43  ;;  %v405_v45 = vld [vmem:[%s565_s4 + $0x30] sm:$0xff]  ;;  %v404_v57 = vld [vmem:[%s565_s4 + $0x28] sm:$0xff]  ;;  %v403_v58 = vld [vmem:[%s565_s4 + $0x20] sm:$0xff] }
   0x8   :  { %v402_v59 = vld [vmem:[%s565_s4 + $0x18] sm:$0xff]  ;;  %v401_v60 = vld [vmem:[%s565_s4 + $0x10] sm:$0xff]  ;;  %v400_v61 = vld [vmem:[%s565_s4 + $0x8] sm:$0xff] }
   0x9   :  { %102 = vmatpush.bf16.msra.mxu1 %v393_v22  ;;  %184 = vmatpush.bf16.msra.mxu2 %v397_v25  ;;  %v75_v29 = vperm.slane %v74_v28, 0  ;;  %v399_v62 = vld [vmem:[%s565_s4] sm:$0xff] }
   0xa   :  { %56 = vmatpush.bf16.msra.mxu0 %v391_v7  ;;  %v148_v63 = vld [vmem:[%s564_s3 + $0x20] sm:$0x1] }
   0xb   :  { %270 = vmatpush.bf16.msra.mxu3 %v405_v45  ;;  %v150_v0 = vunpack.c.l.bf16 %v148_v63 }
   0xd   :  { %332 = vmatmul.msk.bf16.vlgmr.msra.gmra.mxu0 %vm38_vm2, %v22_v8  ;;  %185 = vmatpush.bf16.msra.mxu2 %v396_v26  ;;  %v151_v1 = vperm.slane %v150_v0, 0 }
   0xf   :  { %271 = vmatpush.bf16.msra.mxu3 %v404_v57 }
  0x11   :  { %186 = vmatpush.bf16.msra.mxu2 %v395_v41 }
  0x13   :  { %272 = vmatpush.bf16.msra.mxu3 %v403_v58 }
  0x17   :  { %273 = vmatpush.bf16.msra.mxu3 %v402_v59 }
  0x1b   :  { %274 = vmatpush.bf16.msra.mxu3 %v401_v60 }
  0x1f   :  { %275 = vmatpush.bf16.msra.mxu3 %v400_v61 }
  0x23   :  { %276 = vmatpush.bf16.msra.mxu3 %v399_v62 }
  0x8a   :  { %v493_v9 = vpop.f32.mrf.mxu0 }
  0x8b   :  { %v62_v10 = vsub.f32 0.0, %v493_v9  ;;  %v113_v11 = vmul.f32 %v493_v9, %v493_v9  ;;  %v109_v20 = vsel %vm108_vm3, %v493_v9, 0.0 }
  0x8d   :  { %v63_v12 = vmul.f32 1.442695, %v62_v10  ;;  %v114_v13 = vsel %vm108_vm3, %v113_v11, 0.0 }
  0x8e   :  { %115 = vadd.xlane.f32.xlu1 %v114_v13 }
  0x8f   :  { %410 = vpow2.f32 %v63_v12 }
  0x92   :  { %v60_v14 = vpop.f32.mrf.mxu0 }
  0x95   :  { %v411_v15 = vpop.eup %410 }
  0x96   :  { %v65_v16 = vadd.f32 1.0, %v411_v15  ;;  %v217_v15 = vld [vmem:[%s565_s4 + $0x40] sm:$0x1]  ;;  %s450_s4 = smov [#allocation2]  }
  0x97   :  { %s313_s30 = sshll.u32 %s450_s4, 4  ;;  %s314_s30 = int_to_ptr.vmem [resolvable:$true] %s313_s30 }
  0x98   :  { %412 = vrcp.f32 %v65_v16  ;;  %v219_v16 = vunpack.c.l.bf16 %v217_v15 }
  0x9e   :  { %v413_v17 = vpop.eup %412 }
  0x9f   :  { %v67_v18 = vmul.f32 %v413_v17, %v493_v9  ;;  %v220_v17 = vperm.slane %v219_v16, 0 }
  0xa1   :  { %v73_v19 = vpack.c.bf16 %v67_v18, %v67_v18 }
  0xa3   :  { %77 = vrot.lane.b32.xlu0 %v73_v19, %s449_s0 }
  0xcd   :  { %110 = vadd.xlane.f32.xlu0 %v109_v20 }
 0x101   :  { %v116_v36 = vpop.xlane.xlu1 %115 }
 0x102   :  { %v117_v38 = vmul.f32 0.015625, %v116_v36 }
 0x115   :  { %v78_v23 = vpop.permute.xlu0 %77 }
 0x116   :  { %341 = vmatmul.msk.bf16.vlgmr.msra.gmra.mxu1 %vm91_vm4, %v78_v23 }
 0x140   :  { %v111_v34 = vpop.xlane.xlu0 %110 }
 0x141   :  { %v112_v35 = vmul.f32 0.015625, %v111_v34 }
 0x143   :  { %v118_v37 = vmul.f32 %v112_v35, %v112_v35  ;;  %v120_v51 = vsub.f32 %v493_v9, %v112_v35 }
 0x145   :  { %v119_v39 = vsub.f32 %v117_v38, %v118_v37 }
 0x147   :  { %v121_v40 = vadd.f32 1e-06, %v119_v39 }
 0x149   :  { %414 = vrsqrt.f32 %v121_v40  ;;  %vm128_vm6 = vweird.f32 %v121_v40 }
 0x14f   :  { %v415_v42 = vpop.eup %414 }
 0x150   :  { %v123_v44 = vmul.f32 %v415_v42, %v121_v40  ;;  %vm129_vm5 = vweird.f32 %v415_v42 }
 0x151   :  { %vm130_vm7 = vmor %vm128_vm6, %vm129_vm5 }
 0x152   :  { %v124_v46 = vmul.f32 %v415_v42, %v123_v44 }
 0x154   :  { %v125_v47 = vmul.f32 0.5, %v124_v46 }
 0x156   :  { %v126_v48 = vsub.f32 1.5, %v125_v47 }
 0x158   :  { %v127_v49 = vmul.f32 %v415_v42, %v126_v48 }
 0x15a   :  { %v131_v50 = vsel %vm130_vm7, %v415_v42, %v127_v49 }
 0x15b   :  { %v132_v52 = vmul.f32 %v131_v50, %v120_v51 }
 0x193   :  { %v104_v30 = vpop.f32.mrf.mxu1 }
 0x194   :  { %v105_v31 = vadd.f32 %v104_v30, %v75_v29 }
 0x196   :  { %v133_v32 = vadd.f32 1.0, %v105_v31 }
 0x198   :  { %135 = vrot.lane.b32.xlu1 %v133_v32, %s449_s0 }
 0x19b   :  { %v106_v33 = vpop.f32.mrf.mxu1 }
 0x20a   :  { %v136_v53 = vpop.permute.xlu1 %135 }
 0x20b   :  { %v138_v54 = vmul.f32 %v136_v53, %v132_v52 }
 0x20d   :  { %v139_v55 = vadd.f32 %v138_v54, %v105_v31 }
 0x20f   :  { %v149_v56 = vpack.c.bf16 %v139_v55, %v139_v55 }
 0x211   :  { %358 = vmatmul.msk.bf16.vlgmr.msra.gmra.mxu2 %vm108_vm3, %v149_v56 }
 0x294   :  { %v188_v2 = vpop.f32.mrf.mxu2 }
 0x295   :  { %v189_v3 = vadd.f32 %v188_v2, %v151_v1 }
 0x297   :  { %v193_v4 = vmul.f32 0.044715, %v189_v3  ;;  %v192_v11 = vmul.f32 0.5, %v189_v3 }
 0x299   :  { %v194_v5 = vmul.f32 %v193_v4, %v189_v3 }
 0x29b   :  { %v195_v6 = vmul.f32 %v194_v5, %v189_v3 }
 0x29c   :  { %v190_v7 = vpop.f32.mrf.mxu2 }
 0x29d   :  { %v196_v8 = vadd.f32 %v195_v6, %v189_v3 }
 0x29f   :  { %v197_v9 = vmul.f32 0.7978846, %v196_v8 }
 0x2a1   :  { %416 = vtanh.f32 %v197_v9 }
 0x2a7   :  { %v417_v10 = vpop.eup %416 }
 0x2a8   :  { %v199_v12 = vadd.f32 1.0, %v417_v10 }
 0x2aa   :  { %v200_v13 = vmul.f32 %v199_v12, %v192_v11 }
 0x2ac   :  { %v218_v14 = vpack.c.bf16 %v200_v13, %v200_v13 }
 0x2ae   :  { %277 = vmatmul.bf16.vlgmr.msra.gmra.mxu3 %v218_v14 }
 0x331   :  { %v278_v18 = vpop.f32.mrf.mxu3 }
 0x332   :  { %v279_v19 = vadd.f32 %v278_v18, %v220_v17 }
 0x334   :  { %v283_v20 = vsel %vm282_vm8, %v279_v19, -inf }
 0x335   :  { %284 = vmax.xlane.f32.xlu2 %v283_v20 }
 0x339   :  { %v280_v21 = vpop.f32.mrf.mxu3 }
 0x3a8   :  { %v285_v22 = vpop.xlane.xlu2 %284 }
 0x3a9   :  { %v286_v23 = vsub.f32 %v279_v19, %v285_v22 }
 0x3ab   :  { %v287_v24 = vmul.f32 1.442695, %v286_v23 }
 0x3ad   :  { %418 = vpow2.f32 %v287_v24 }
 0x3b3   :  { %v419_v25 = vpop.eup %418 }
 0x3b4   :  { %v289_v26 = vsel %vm282_vm8, %v419_v25, 0.0 }
 0x3b5   :  { %290 = vadd.xlane.f32.xlu2 %v289_v26 }
 0x428   :  { %v291_v27 = vpop.xlane.xlu2 %290 }
 0x429   :  { %420 = vrcp.f32 %v291_v27  ;;  %v303_v31 = vand.u32 2147483648, %v291_v27  ;;  %v301_v33 = vand.u32 2147483647, %v291_v27  ;;  %vm297_vm10 = vweird.f32 %v291_v27 }
 0x42b   :  { %v304_v35 = vor.u32 1.1754944e-38, %v303_v31  ;;  %vm302_vm12 = vcmp.eq.f32.partialorder %v301_v33, 8.507059e+37 }
 0x42f   :  { %v421_v28 = vpop.eup %420 }
 0x430   :  { %v293_v29 = vmul.f32 %v421_v28, %v291_v27  ;;  %vm298_vm9 = vweird.f32 %v421_v28 }
 0x431   :  { %vm299_vm11 = vmor %vm297_vm10, %vm298_vm9 }
 0x432   :  { %v294_v30 = vsub.f32 1.0, %v293_v29 }
 0x434   :  { %v295_v32 = vmul.f32 %v421_v28, %v294_v30 }
 0x436   :  { %v296_v34 = vadd.f32 %v421_v28, %v295_v32 }
 0x438   :  { %v300_v36 = vsel %vm299_vm11, %v421_v28, %v296_v34 }
 0x439   :  { %v305_v37 = vsel %vm302_vm12, %v304_v35, %v300_v36 }
 0x43a   :  { %v306_v38 = vmul.f32 %v419_v25, %v305_v37 }
 0x43c   :  { %307 = vst.msk [vmem:[#allocation2] sm:$0xff] %vm282_vm8, %v306_v38 }
 0x43d   :  { %318 = dma.vmem_to_hbm [thread:$0]  %s314_s30, 128, %s316_s8, [#allocation3]  }
 0x43e   :  { %446 = dma.done.wait [#allocation3], 128  }
 0x43f   :  { %447 = vsyncadd [#allocation3], 4294967168 }
 0x440   :  { %323 = vsyncpa [#allocation3], 1 }

</bundles_post_ra>
